<compile_context>
chip_gen: v5e
topology: v5e:2x2
jax: 0.10.0
libtpu: 0.0.40
codegen_flags: <defaults>
</compile_context>

<pallas_src>
import jax
import jax.numpy as jnp
import numpy as np
from jax.experimental import pallas as pl
from jax.experimental.pallas import tpu as pltpu

RADIUS = 4.5
EPS = 1e-8


def _pick_packing(batch_size, nodes_per_graph, target_rows=256, min_steps=2):
  """Graphs per grid step G.

  Targets M = G*n >= target_rows (256 keeps a v6e/v7x 256x256 MXU tile full;
  128 suffices on v5e), keeps >= min_steps grid steps when possible (v7x has 2
  TensorCores and the grid axis is 'parallel'), and keeps the packed row block
  8-sublane aligned (or equal to the full array, which is always legal).
  """
  cands = [g for g in range(1, batch_size + 1)
           if batch_size % g == 0
           and ((g * nodes_per_graph) % 8 == 0 or g == batch_size)]
  multi = [g for g in cands if batch_size // g >= min_steps]
  pool = multi or cands
  hits = [g for g in pool if g * nodes_per_graph >= target_rows]
  return min(hits) if hits else max(pool)


def _make_kernel(G, n, H):
  """Kernel closure over the packing factor G, nodes/graph n, hidden H."""
  H2 = 2 * H

  def kernel(x_ref, pos_ref, w1_ref, w1d_ref, b1_ref, w2_ref, b2_ref, out_ref):
    # ---- fused first layers of net1|net2 + folded center projection --------
    # x_ref: (M, H) bf16, M = G*n.  w1_ref: (H, 4H) bf16,
    # columns [:2H] = x_i weights (net1|net2), [2H:] = x_j weights (net1|net2).
    h_full = jnp.dot(x_ref[...], w1_ref[...],
                     preferred_element_type=jnp.float32)          # (M, 4H) one MXU pass
    h_full = h_full.reshape(G, n, 2 * H2)                         # split leading dim only

    pos = pos_ref[...].reshape(G, n, 3)                           # split leading dim only
    diff = pos - pos[:, 0:1, :]                                   # pos_i - pos_center
    dx = diff[:, :, 0:1]
    dy = diff[:, :, 1:2]
    dz = diff[:, :, 2:3]
    dist = jnp.sqrt(dx * dx + dy * dy + dz * dz)                  # (G, n, 1), pure VPU
    valid = (dist <= RADIUS).astype(jnp.float32)                  # radius mask (per graph)

    # x_j term: local row 0 (center node) of each graph, broadcast down its rows.
    h = (h_full[:, :, :H2] + h_full[:, 0:1, H2:]
         + dist * w1d_ref[...] + b1_ref[...])                     # (G, n, 2H)
    h = jnp.maximum(h, 0.0)

    # ---- second layers as VPU mul + segmented lane reductions (no MXU) -----
    hw = h * w2_ref[...]                                          # (G, n, 2H)
    b2 = b2_ref[...]                                              # (1, 2)
    mes1 = jnp.sum(hw[:, :, :H], axis=-1, keepdims=True) + b2[:, 0:1]   # (G, n, 1)
    mes2 = jnp.sum(hw[:, :, H:], axis=-1, keepdims=True) + b2[:, 1:2]

    # ---- geometry epilogue --------------------------------------------------
    # omega(dist), p = 5, Horner form: 1 + r^5 * (-21 + r*(35 - 15 r))
    r = dist * (1.0 / RADIUS)
    r2 = r * r
    r5 = r2 * r2 * r
    coe = 1.0 + r5 * (-21.0 + r * (35.0 - 15.0 * r))

    norm_vec = diff * pl.reciprocal(dist + EPS, approx=True)      # EUP, no divide
    w = coe * valid                                               # fold radius mask in
    vec1 = norm_vec * (w * mes1)                                  # (G, n, 3)
    vec2 = norm_vec * (w * mes2)

    cnt = jnp.sum(valid, axis=1)                                  # (G, 1) incl. self edge (loop=True)
    inv = pl.reciprocal(cnt, approx=True)
    v1 = jnp.sum(vec1, axis=1) * inv                              # (G, 3)
    v2 = jnp.sum(vec2, axis=1) * inv                              # (G, 3)
    out_ref[0] = jnp.concatenate(
        [v1, v2, jnp.zeros((G, 2), jnp.float32)], axis=-1)        # one (G, 8) block store

  return kernel


def gram_schmidt(v1, v2):
  n1 = v1 / (jnp.linalg.norm(v1, axis=-1, keepdims=True) + EPS)
  n2p = v2 - jnp.sum(n1 * v2, axis=-1, keepdims=True) * n1
  n2 = n2p / (jnp.linalg.norm(n2p, axis=-1, keepdims=True) + EPS)
  n3 = jnp.cross(n1, n2)
  return jnp.stack([n1, n2, n3], axis=-2)        # [B, 3, 3]


def init_params(key, hidden):
  """Deterministic synthetic parameters (nn.Linear-style uniform init)."""
  h = hidden
  d_in = 2 * h + 1
  ks = jax.random.split(key, 8)

  def lin(k, fan_in, shape):
    bound = 1.0 / np.sqrt(fan_in)
    return jax.random.uniform(k, shape, jnp.float32, -bound, bound)

  params = {}
  for name, kk in (("net1", ks[0:4]), ("net2", ks[4:8])):
    W1 = lin(kk[0], d_in, (d_in, h))   # Linear(2H+1 -> H), stored as [in, out]
    b1 = lin(kk[1], d_in, (1, h))
    W2 = lin(kk[2], h, (h, 1))         # Linear(H -> 1)
    b2 = lin(kk[3], h, (1, 1))
    params[name] = (W1, b1, W2, b2)
  return params


def equivariant_layer_forward(params, x, pos, batch, batch_size, nodes_per_graph,
                              target_rows=256):
  # `batch` is assumed contiguous with equal-sized graphs (node b*n is graph
  # b's first node == the center node picked by the PyTorch forward).
  del batch
  N, H = x.shape
  n = nodes_per_graph
  assert N == batch_size * n, "demo assumes contiguous equal-sized graphs"
  x = x.astype(jnp.float32)
  pos = pos.astype(jnp.float32)

  G = _pick_packing(batch_size, n, target_rows=target_rows)
  steps = batch_size // G
  M = G * n

  # ----- fuse net1 | net2 parameters ---------------------------------------
  W1_a, b1_a, W2_a, b2_a = params["net1"]
  W1_b, b1_b, W2_b, b2_b = params["net2"]
  W1f = jnp.concatenate(
      [jnp.concatenate([W1_a[:H], W1_b[:H]], axis=1),              # x_i columns
       jnp.concatenate([W1_a[H:2 * H], W1_b[H:2 * H]], axis=1)],   # x_j (center) columns
      axis=1).astype(jnp.bfloat16)                                 # (H, 4H) bf16 (MXU)
  w1d = jnp.concatenate([W1_a[2 * H:], W1_b[2 * H:]], axis=1)      # (1, 2H) dist row (f32)
  b1f = jnp.concatenate([b1_a, b1_b], axis=1)                      # (1, 2H)
  w2row = jnp.concatenate([W2_a.reshape(1, H), W2_b.reshape(1, H)], axis=1)  # (1, 2H)
  b2f = jnp.concatenate([b2_a, b2_b], axis=1)                      # (1, 2)

  x_bf = x.astype(jnp.bfloat16)                                    # (N, H)

  in_specs = [
      pl.BlockSpec((M, H), lambda s: (s, 0)),       # packed node features for G graphs
      pl.BlockSpec((M, 3), lambda s: (s, 0)),       # packed positions
      pl.BlockSpec((H, 4 * H), lambda s: (0, 0)),   # fused W1 (x_i | x_j), bf16, resident
      pl.BlockSpec((1, 2 * H), lambda s: (0, 0)),   # fused W1 dist row
      pl.BlockSpec((1, 2 * H), lambda s: (0, 0)),   # fused b1
      pl.BlockSpec((1, 2 * H), lambda s: (0, 0)),   # fused W2 row (VPU second layer)
      pl.BlockSpec((1, 2), lambda s: (0, 0)),       # fused b2
  ]
  out_specs = pl.BlockSpec((1, G, 8), lambda s: (s, 0, 0))
  out_shape = jax.ShapeDtypeStruct((steps, G, 8), jnp.float32)

  # Tight, size-derived VMEM cap (blocks are tiny; leave generous headroom but
  # don't claim half of v7x's 64 MiB for a few-KB working set).
  block_bytes = (M * H * 2 + M * 3 * 4 + H * 4 * H * 2
                 + 3 * (2 * H) * 4 + 2 * 4 + G * 8 * 4)
  vmem_limit = int(min(64 << 20, max(4 << 20, 8 * block_bytes)))

  v12 = pl.pallas_call(
      _make_kernel(G, n, H),
      out_shape=out_shape,
      grid_spec=pltpu.PrefetchScalarGridSpec(
          num_scalar_prefetch=0,
          grid=(steps,),
          in_specs=in_specs,
          out_specs=out_specs),
      compiler_params=pltpu.CompilerParams(
          dimension_semantics=("parallel",),        # shard steps across TCs (v7x megacore)
          vmem_limit_bytes=vmem_limit),
  )(x_bf, pos, W1f, w1d, b1f, w2row, b2f)

  v12 = v12.reshape(batch_size, 8)                  # strip per-graph padding
  v1, v2 = v12[:, :3], v12[:, 3:6]
  frames = gram_schmidt(v1, v2)                     # [B, 3, 3]
  return frames, (v1, v2)


def ref_mean_vectors(params, x, pos, batch, batch_size):
  """Pure numpy reference for the per-graph mean message vectors."""
  x = np.asarray(x, np.float32)
  pos = np.asarray(pos, np.float32)
  batch = np.asarray(batch)

  def mlp(net, xij):
    W1, b1, W2, b2 = [np.asarray(t, np.float32) for t in net]
    h = np.maximum(xij @ W1 + b1, 0.0)
    return h @ W2 + b2

  v1s, v2s = [], []
  for b in range(batch_size):
    c = np.nonzero(batch == b)[0][0]
    diff = pos - pos[c]
    dist = np.linalg.norm(diff, axis=-1, keepdims=True)
    valid = (batch == b) & (dist[:, 0] <= RADIUS)
    xij = np.concatenate([x, np.broadcast_to(x[c], x.shape), dist], axis=-1)
    mes1 = mlp(params["net1"], xij)
    mes2 = mlp(params["net2"], xij)
    r = dist / RADIUS
    coe = 1.0 - 21.0 * r ** 5 + 35.0 * r ** 6 - 15.0 * r ** 7
    nv = diff / (dist + EPS)
    vec1 = nv * coe * mes1
    vec2 = nv * coe * mes2
    v1s.append(vec1[valid].mean(axis=0))
    v2s.append(vec2[valid].mean(axis=0))
  return np.stack(v1s), np.stack(v2s)


if __name__ == "__main__":
  hidden_features = 32
  batch_size = 4
  nodes_per_graph = 8
  N = batch_size * nodes_per_graph
  H = hidden_features

  key = jax.random.PRNGKey(0)
  k_param, k_x, k_pos = jax.random.split(key, 3)

  params = init_params(k_param, hidden_features)
  x = jax.random.normal(k_x, (N, hidden_features), jnp.float32)
  pos = jax.random.uniform(k_pos, (N, 3), jnp.float32, 0.0, 3.0)
  batch = jnp.repeat(jnp.arange(batch_size, dtype=jnp.int32), nodes_per_graph)

  frames, (v1, v2) = equivariant_layer_forward(
      params, x, pos, batch, batch_size, nodes_per_graph)
  frames = jax.block_until_ready(frames)

  # Sanity-check the Pallas hot path against a pure-numpy reference that models
  # the same bf16 quantization of x and the x_i|x_j rows of W1.
  def q(a):
    return np.asarray(jnp.asarray(a, jnp.float32).astype(jnp.bfloat16)
                      .astype(jnp.float32))

  x_q = q(x)
  params_ref = {}
  for name in ("net1", "net2"):
    W1, b1, W2, b2 = [np.asarray(t, np.float32) for t in params[name]]
    W1 = W1.copy()
    W1[:2 * H] = q(W1[:2 * H])      # x_i and x_j rows are bf16 in the kernel
    params_ref[name] = (W1, b1, W2, b2)

  v1_ref, v2_ref = ref_mean_vectors(params_ref, x_q, pos, batch, batch_size)
  np.testing.assert_allclose(np.asarray(v1), v1_ref, rtol=5e-2, atol=2e-3)
  np.testing.assert_allclose(np.asarray(v2), v2_ref, rtol=5e-2, atol=2e-3)
  assert frames.shape == (batch_size, 3, 3)

  print("KERNEL_OK")
</pallas_src>

<mosaic_0001>
module attributes {stable_mosaic.version = 11 : i64} {
  func.func @kernel(%arg0: i32, %arg1: memref<16x32xbf16, #tpu.memory_space<vmem>>, %arg2: memref<16x3xf32, #tpu.memory_space<vmem>>, %arg3: memref<32x128xbf16, #tpu.memory_space<vmem>>, %arg4: memref<1x64xf32, #tpu.memory_space<vmem>>, %arg5: memref<1x64xf32, #tpu.memory_space<vmem>>, %arg6: memref<1x64xf32, #tpu.memory_space<vmem>>, %arg7: memref<1x2xf32, #tpu.memory_space<vmem>>, %arg8: memref<1x2x8xf32, #tpu.memory_space<vmem>>) attributes {dimension_semantics = [#tpu.dimension_semantics<parallel>], iteration_bounds = array<i64: 2>, scalar_prefetch = 0 : i64, scratch_operands = 0 : i64, tpu.core_type = #tpu.core_type<tc>, window_params = [{transform_indices = @transform_0, window_bounds = array<i64: 16, 32>}, {transform_indices = @transform_1, window_bounds = array<i64: 16, 3>}, {pipeline_mode = #tpu.pipeline_mode<synchronous>, transform_indices = @transform_2, window_bounds = array<i64: 32, 128>}, {pipeline_mode = #tpu.pipeline_mode<synchronous>, transform_indices = @transform_3, window_bounds = array<i64: 1, 64>}, {pipeline_mode = #tpu.pipeline_mode<synchronous>, transform_indices = @transform_4, window_bounds = array<i64: 1, 64>}, {pipeline_mode = #tpu.pipeline_mode<synchronous>, transform_indices = @transform_5, window_bounds = array<i64: 1, 64>}, {pipeline_mode = #tpu.pipeline_mode<synchronous>, transform_indices = @transform_6, window_bounds = array<i64: 1, 2>}, {transform_indices = @transform_7, window_bounds = array<i64: 1, 2, 8>}]} {
    %c0 = arith.constant 0 : index
    %c0_0 = arith.constant 0 : index
    %0 = vector.load %arg1[%c0, %c0_0] : memref<16x32xbf16, #tpu.memory_space<vmem>>, vector<16x32xbf16>
    %c0_1 = arith.constant 0 : index
    %c0_2 = arith.constant 0 : index
    %1 = vector.load %arg3[%c0_1, %c0_2] : memref<32x128xbf16, #tpu.memory_space<vmem>>, vector<32x128xbf16>
    %cst = arith.constant dense<0.000000e+00> : vector<16x128xf32>
    %2 = tpu.matmul %0, %1, %cst {dimension_numbers = #tpu.dot_dimension_numbers<[1], [0], [0], [1], [0, 0, 1, 1], [], []>} : vector<16x32xbf16>, vector<32x128xbf16>, vector<16x128xf32> -> vector<16x128xf32>
    %3 = vector.shape_cast %2 : vector<16x128xf32> to vector<2x8x128xf32>
    %c0_3 = arith.constant 0 : index
    %c0_4 = arith.constant 0 : index
    %4 = vector.load %arg2[%c0_3, %c0_4] : memref<16x3xf32, #tpu.memory_space<vmem>>, vector<16x3xf32>
    %5 = vector.shape_cast %4 : vector<16x3xf32> to vector<2x8x3xf32>
    %6 = vector.extract_strided_slice %5 {offsets = [0, 0, 0], sizes = [2, 1, 3], strides = [1, 1, 1]} : vector<2x8x3xf32> to vector<2x1x3xf32>
    %7 = vector.broadcast %6 : vector<2x1x3xf32> to vector<2x8x3xf32>
    %8 = arith.subf %5, %7 : vector<2x8x3xf32>
    %9 = vector.extract_strided_slice %8 {offsets = [0, 0, 0], sizes = [2, 8, 1], strides = [1, 1, 1]} : vector<2x8x3xf32> to vector<2x8x1xf32>
    %10 = vector.extract_strided_slice %8 {offsets = [0, 0, 1], sizes = [2, 8, 1], strides = [1, 1, 1]} : vector<2x8x3xf32> to vector<2x8x1xf32>
    %11 = vector.extract_strided_slice %8 {offsets = [0, 0, 2], sizes = [2, 8, 1], strides = [1, 1, 1]} : vector<2x8x3xf32> to vector<2x8x1xf32>
    %12 = arith.mulf %9, %9 : vector<2x8x1xf32>
    %13 = arith.mulf %10, %10 : vector<2x8x1xf32>
    %14 = arith.addf %12, %13 : vector<2x8x1xf32>
    %15 = arith.mulf %11, %11 : vector<2x8x1xf32>
    %16 = arith.addf %14, %15 : vector<2x8x1xf32>
    %17 = math.sqrt %16 : vector<2x8x1xf32>
    %cst_5 = arith.constant 4.500000e+00 : f32
    %18 = vector.broadcast %cst_5 : f32 to vector<2x8x1xf32>
    %19 = arith.cmpf ole, %17, %18 : vector<2x8x1xf32>
    %20 = arith.extui %19 : vector<2x8x1xi1> to vector<2x8x1xi32>
    %21 = arith.sitofp %20 : vector<2x8x1xi32> to vector<2x8x1xf32>
    %22 = vector.extract_strided_slice %3 {offsets = [0, 0, 0], sizes = [2, 8, 64], strides = [1, 1, 1]} : vector<2x8x128xf32> to vector<2x8x64xf32>
    %23 = vector.extract_strided_slice %3 {offsets = [0, 0, 64], sizes = [2, 1, 64], strides = [1, 1, 1]} : vector<2x8x128xf32> to vector<2x1x64xf32>
    %24 = vector.broadcast %23 : vector<2x1x64xf32> to vector<2x8x64xf32>
    %25 = arith.addf %22, %24 : vector<2x8x64xf32>
    %c0_6 = arith.constant 0 : index
    %c0_7 = arith.constant 0 : index
    %26 = vector.load %arg4[%c0_6, %c0_7] : memref<1x64xf32, #tpu.memory_space<vmem>>, vector<1x64xf32>
    %27 = vector.shape_cast %26 : vector<1x64xf32> to vector<1x1x64xf32>
    %28 = vector.broadcast %17 : vector<2x8x1xf32> to vector<2x8x64xf32>
    %29 = vector.broadcast %27 : vector<1x1x64xf32> to vector<2x8x64xf32>
    %30 = arith.mulf %28, %29 : vector<2x8x64xf32>
    %31 = arith.addf %25, %30 : vector<2x8x64xf32>
    %c0_8 = arith.constant 0 : index
    %c0_9 = arith.constant 0 : index
    %32 = vector.load %arg5[%c0_8, %c0_9] : memref<1x64xf32, #tpu.memory_space<vmem>>, vector<1x64xf32>
    %33 = vector.shape_cast %32 : vector<1x64xf32> to vector<1x1x64xf32>
    %34 = vector.broadcast %33 : vector<1x1x64xf32> to vector<2x8x64xf32>
    %35 = arith.addf %31, %34 : vector<2x8x64xf32>
    %cst_10 = arith.constant 0.000000e+00 : f32
    %36 = vector.broadcast %cst_10 : f32 to vector<2x8x64xf32>
    %37 = arith.maximumf %35, %36 : vector<2x8x64xf32>
    %c0_11 = arith.constant 0 : index
    %c0_12 = arith.constant 0 : index
    %38 = vector.load %arg6[%c0_11, %c0_12] : memref<1x64xf32, #tpu.memory_space<vmem>>, vector<1x64xf32>
    %39 = vector.shape_cast %38 : vector<1x64xf32> to vector<1x1x64xf32>
    %40 = vector.broadcast %39 : vector<1x1x64xf32> to vector<2x8x64xf32>
    %41 = arith.mulf %37, %40 : vector<2x8x64xf32>
    %c0_13 = arith.constant 0 : index
    %c0_14 = arith.constant 0 : index
    %42 = vector.load %arg7[%c0_13, %c0_14] : memref<1x2xf32, #tpu.memory_space<vmem>>, vector<1x2xf32>
    %43 = vector.extract_strided_slice %41 {offsets = [0, 0, 0], sizes = [2, 8, 32], strides = [1, 1, 1]} : vector<2x8x64xf32> to vector<2x8x32xf32>
    %cst_15 = arith.constant dense<0.000000e+00> : vector<2x8xf32>
    %44 = vector.multi_reduction <add>, %43, %cst_15 [2] : vector<2x8x32xf32> to vector<2x8xf32>
    %45 = vector.shape_cast %44 : vector<2x8xf32> to vector<2x8x1xf32>
    %46 = vector.extract_strided_slice %42 {offsets = [0, 0], sizes = [1, 1], strides = [1, 1]} : vector<1x2xf32> to vector<1x1xf32>
    %47 = vector.shape_cast %46 : vector<1x1xf32> to vector<1x1x1xf32>
    %48 = vector.broadcast %47 : vector<1x1x1xf32> to vector<2x8x1xf32>
    %49 = arith.addf %45, %48 : vector<2x8x1xf32>
    %50 = vector.extract_strided_slice %41 {offsets = [0, 0, 32], sizes = [2, 8, 32], strides = [1, 1, 1]} : vector<2x8x64xf32> to vector<2x8x32xf32>
    %cst_16 = arith.constant dense<0.000000e+00> : vector<2x8xf32>
    %51 = vector.multi_reduction <add>, %50, %cst_16 [2] : vector<2x8x32xf32> to vector<2x8xf32>
    %52 = vector.shape_cast %51 : vector<2x8xf32> to vector<2x8x1xf32>
    %53 = vector.extract_strided_slice %42 {offsets = [0, 1], sizes = [1, 1], strides = [1, 1]} : vector<1x2xf32> to vector<1x1xf32>
    %54 = vector.shape_cast %53 : vector<1x1xf32> to vector<1x1x1xf32>
    %55 = vector.broadcast %54 : vector<1x1x1xf32> to vector<2x8x1xf32>
    %56 = arith.addf %52, %55 : vector<2x8x1xf32>
    %cst_17 = arith.constant 0.222222224 : f32
    %57 = vector.broadcast %cst_17 : f32 to vector<2x8x1xf32>
    %58 = arith.mulf %17, %57 : vector<2x8x1xf32>
    %59 = arith.mulf %58, %58 : vector<2x8x1xf32>
    %60 = arith.mulf %59, %59 : vector<2x8x1xf32>
    %61 = arith.mulf %60, %58 : vector<2x8x1xf32>
    %cst_18 = arith.constant 1.500000e+01 : f32
    %62 = vector.broadcast %cst_18 : f32 to vector<2x8x1xf32>
    %63 = arith.mulf %62, %58 : vector<2x8x1xf32>
    %cst_19 = arith.constant 3.500000e+01 : f32
    %64 = vector.broadcast %cst_19 : f32 to vector<2x8x1xf32>
    %65 = arith.subf %64, %63 : vector<2x8x1xf32>
    %66 = arith.mulf %58, %65 : vector<2x8x1xf32>
    %cst_20 = arith.constant -2.100000e+01 : f32
    %67 = vector.broadcast %cst_20 : f32 to vector<2x8x1xf32>
    %68 = arith.addf %67, %66 : vector<2x8x1xf32>
    %69 = arith.mulf %61, %68 : vector<2x8x1xf32>
    %cst_21 = arith.constant 1.000000e+00 : f32
    %70 = vector.broadcast %cst_21 : f32 to vector<2x8x1xf32>
    %71 = arith.addf %70, %69 : vector<2x8x1xf32>
    %cst_22 = arith.constant 9.99999993E-9 : f32
    %72 = vector.broadcast %cst_22 : f32 to vector<2x8x1xf32>
    %73 = arith.addf %17, %72 : vector<2x8x1xf32>
    %74 = tpu.reciprocal %73 {approx = true} : vector<2x8x1xf32> -> vector<2x8x1xf32>
    %75 = vector.broadcast %74 : vector<2x8x1xf32> to vector<2x8x3xf32>
    %76 = arith.mulf %8, %75 : vector<2x8x3xf32>
    %77 = arith.mulf %71, %21 : vector<2x8x1xf32>
    %78 = arith.mulf %77, %49 : vector<2x8x1xf32>
    %79 = vector.broadcast %78 : vector<2x8x1xf32> to vector<2x8x3xf32>
    %80 = arith.mulf %76, %79 : vector<2x8x3xf32>
    %81 = arith.mulf %77, %56 : vector<2x8x1xf32>
    %82 = vector.broadcast %81 : vector<2x8x1xf32> to vector<2x8x3xf32>
    %83 = arith.mulf %76, %82 : vector<2x8x3xf32>
    %cst_23 = arith.constant dense<0.000000e+00> : vector<2x1xf32>
    %84 = vector.multi_reduction <add>, %21, %cst_23 [1] : vector<2x8x1xf32> to vector<2x1xf32>
    %85 = tpu.reciprocal %84 {approx = true} : vector<2x1xf32> -> vector<2x1xf32>
    %cst_24 = arith.constant dense<0.000000e+00> : vector<2x3xf32>
    %86 = vector.multi_reduction <add>, %80, %cst_24 [1] : vector<2x8x3xf32> to vector<2x3xf32>
    %87 = vector.broadcast %85 : vector<2x1xf32> to vector<2x3xf32>
    %88 = arith.mulf %86, %87 : vector<2x3xf32>
    %cst_25 = arith.constant dense<0.000000e+00> : vector<2x3xf32>
    %89 = vector.multi_reduction <add>, %83, %cst_25 [1] : vector<2x8x3xf32> to vector<2x3xf32>
    %90 = vector.broadcast %85 : vector<2x1xf32> to vector<2x3xf32>
    %91 = arith.mulf %89, %90 : vector<2x3xf32>
    %cst_26 = arith.constant 0.000000e+00 : f32
    %92 = vector.broadcast %cst_26 : f32 to vector<2x2xf32>
    %93 = tpu.concatenate %88, %91, %92 in 1 : vector<2x3xf32>, vector<2x3xf32>, vector<2x2xf32> -> vector<2x8xf32>
    %c0_27 = arith.constant 0 : index
    %c0_28 = arith.constant 0 : index
    %c0_29 = arith.constant 0 : index
    %94 = vector.load %arg8[%c0_27, %c0_28, %c0_29] : memref<1x2x8xf32, #tpu.memory_space<vmem>>, vector<1x2x8xf32>
    %95 = vector.shape_cast %94 : vector<1x2x8xf32> to vector<2x8xf32>
    %96 = vector.shape_cast %93 : vector<2x8xf32> to vector<1x2x8xf32>
    tpu.vector_store %arg8[%c0_27, %c0_28, %c0_29], %96 {strides = array<i32>} : memref<1x2x8xf32, #tpu.memory_space<vmem>>, vector<1x2x8xf32>,
    return
  }
  func.func @transform_0(%arg0: i32) -> (i32, i32) {
    %c0_i32 = arith.constant 0 : i32
    %c0_i32_0 = arith.constant 0 : i32
    return %arg0, %c0_i32 : i32, i32
  }
  func.func @transform_1(%arg0: i32) -> (i32, i32) {
    %c0_i32 = arith.constant 0 : i32
    %c0_i32_0 = arith.constant 0 : i32
    return %arg0, %c0_i32 : i32, i32
  }
  func.func @transform_2(%arg0: i32) -> (i32, i32) {
    %c0_i32 = arith.constant 0 : i32
    %c0_i32_0 = arith.constant 0 : i32
    %c0_i32_1 = arith.constant 0 : i32
    return %c0_i32, %c0_i32_0 : i32, i32
  }
  func.func @transform_3(%arg0: i32) -> (i32, i32) {
    %c0_i32 = arith.constant 0 : i32
    %c0_i32_0 = arith.constant 0 : i32
    %c0_i32_1 = arith.constant 0 : i32
    return %c0_i32, %c0_i32_0 : i32, i32
  }
  func.func @transform_4(%arg0: i32) -> (i32, i32) {
    %c0_i32 = arith.constant 0 : i32
    %c0_i32_0 = arith.constant 0 : i32
    %c0_i32_1 = arith.constant 0 : i32
    return %c0_i32, %c0_i32_0 : i32, i32
  }
  func.func @transform_5(%arg0: i32) -> (i32, i32) {
    %c0_i32 = arith.constant 0 : i32
    %c0_i32_0 = arith.constant 0 : i32
    %c0_i32_1 = arith.constant 0 : i32
    return %c0_i32, %c0_i32_0 : i32, i32
  }
  func.func @transform_6(%arg0: i32) -> (i32, i32) {
    %c0_i32 = arith.constant 0 : i32
    %c0_i32_0 = arith.constant 0 : i32
    %c0_i32_1 = arith.constant 0 : i32
    return %c0_i32, %c0_i32_0 : i32, i32
  }
  func.func @transform_7(%arg0: i32) -> (i32, i32, i32) {
    %c0_i32 = arith.constant 0 : i32
    %c0_i32_0 = arith.constant 0 : i32
    %c0_i32_1 = arith.constant 0 : i32
    return %arg0, %c0_i32, %c0_i32_0 : i32, i32, i32
  }
}

</mosaic_0001>

<bundles_post_ra>
// kernel: tpu_custom_call.1
= control target key start
LH: loop header
LB: loop body
LE: loop exit
PB: predicated region body
PF: predicated region fallthrough
CT: control target
= control target key end

     0   :  { %12 = vsyncpa [#allocation3], 0  ;;  %s1080_s0 = inlined_call_operand.vmem [shape: bf16[32,32], index: 0, kind: input, shape index: {}]   ;;  %s1081_s1 = inlined_call_operand.vmem [shape: f32[32,3], index: 1, kind: input, shape index: {}]   ;;  %s1082_s2 = inlined_call_operand.vmem [shape: bf16[32,128], index: 2, kind: input, shape index: {}]   ;;  %s1083_s3 = inlined_call_operand.vmem [shape: f32[1,64], index: 3, kind: input, shape index: {}]   ;;  %s1084_s4 = inlined_call_operand.vmem [shape: f32[1,64], index: 4, kind: input, shape index: {}]   ;;  %s1085_s5 = inlined_call_operand.vmem [shape: f32[1,64], index: 5, kind: input, shape index: {}]   ;;  %s1086_s6 = inlined_call_operand.vmem [shape: f32[1,2], index: 6, kind: input, shape index: {}]   ;;  %s1087_s7 = inlined_call_operand.hbm [shape: f32[2,2,8], index: 7, kind: output, shape index: {}]  }
   0x1   :  { %14 = vsyncpa [#allocation3 + $0x1], 0  ;;  %s915_s24 = smov 0   ;;  %s917_s25 = smov 0  }
   0x2   :  { %s919_s26 = smov 0   ;;  %s921_s27 = smov 0  }
   0x3 LB: > { %s707_s28 = sadd.s32 4294967295, %s866_s27   ;;  %s708_s29 = sadd.s32 4294967294, %s866_s27   ;;  %s866_s27 = sphi %s921_s27, %s1093_s27   ;;  %s862_s26 = sphi %s919_s26, %s1092_s26   ;;  %s858_s25 = sphi %s917_s25, %s1091_s25   ;;  %s854_s24 = sphi %s915_s24, %s1090_s24  }
   0x4   : > { %s938_s30 = sadd.s32 1, %s866_s27   ;;  %s184_s8 = sadd.s32 1, %s862_s26 }
   0x5   : > { %s181_s9 = ssub.s32 %s866_s27, %s938_s30  ;;  %p194_p0 = scmp.ne.s32.totalorder %s862_s26, %s858_s25 }
   0x6   : > { %p182_p1 = scmp.eq.s32.totalorder %s181_s9, 0  ;;  %p195_p2 = scmp.eq.s32.totalorder %s707_s28, 1 }
   0x7   : > { %p200_p3 = scmp.ne.s32.totalorder %s858_s25, %s854_s24  ;;  %p201_p4 = scmp.eq.s32.totalorder %s708_s29, 1 }
   0x8   : > { %s948_s10 = scalar_select %p182_p1, %s862_s26, %s184_s8  }
   0x9   : > { %p950_p5 = por %p195_p2, %p194_p0  ;;  %p954_p6 = por %p201_p4, %p200_p3 }
   0xa   : > { %p711_p7 = scmp.ge.s32.totalorder %s866_s27, 1  ;;  %p252_p8 = scmp.lt.s32.totalorder %s866_s27, 3 }
   0xc   : > { %p253_p9 = pnand %p711_p7, %p252_p8 }
   0xd   : > { %s963_s15 = sshll.u32 (!%p253_p9), %s707_s28, 1  ;;  %s868_s9 = smov (!%p253_p9), 127  }
   0xe   : > { %256 = sbr.rel (%p253_p9) target bundleno = 884 (0x374), region = 48  ;;  %p290_p10 = scmp.lt.s32.totalorder (!%p253_p9), %s963_s15, 3 }
   0xf   : > { %s869_s13 = smov (!%p253_p9), 126   ;;  %s871_s14 = smov (!%p253_p9), 64  }
  0x10   : > { %s873_s22 = smov (!%p253_p9), 96   ;;  %s874_s28 = smov (!%p253_p9), 3  }
  0x11   : > { %s632_s16 = scalar_lea.hbm (!%p253_p9), %s1087_s7, %s963_s15  ;;  %s824_s29 = scalar_lea.hbm (!%p253_p9), %s1087_s7, 4 }
  0x13   : > { %v738_v0 = vld [vmem:[%s1082_s2 + $0x8] sm:$0xff]  ;;  %v737_v1 = vld [vmem:[%s1082_s2] sm:$0xff]  ;;  %s291_s18 = scalar_select %p290_p10, %s963_s15, 3  ;;  %vm325_vm0 = vcmask 261120   ;;  %v870_v11 = vmov 0   ;;  %vm545_vm6 = vcmask 7168  }
  0x14   : > { %335 = vmatpush.bf16.msra.mxu0 %v738_v0  ;;  %785 = vset.pattern.permute.xlu0 %v870_v11  ;;  %v872_v51 = vmov 0.0   ;;  %vm562_vm8 = vcmask 23552   ;;  %vm607_vm9 = vcmask 1041409   ;;  %vm617_vm10 = vcmask 48128  }
  0x15   : > { %s714_s19 = sshll.u32 %s291_s18, 2  ;;  %s716_s20 = sshll.u32 %s291_s18, 3  ;;  %786 = vset.pattern.permute.xlu1 %v870_v11  ;;  %787 = vset.pattern.permute.xlu2 %v870_v11  ;;  %vm619_vm11 = vcmask 58368  }
  0x16   : > { %s293_s23 = scalar_lea.vmem %s1080_s0, %s714_s19  ;;  %s299_s8 = scalar_lea.vmem %s1081_s1, %s716_s20 }
  0x17   : > { %v736_v2 = vld [vmem:[%s293_s23] sm:$0xff]  ;;  %v344_v4 = vld [vmem:[%s299_s8 + $0x8] sm:$0xff]  ;;  %s636_s19 = sshll.u32 %s632_s16, 4  ;;  %s637_s19 = int_to_ptr.hbm [resolvable:$true] %s636_s19 }
  0x18   : > { %336 = vmatpush.bf16.msra.mxu0 %v737_v1  ;;  %v343_v3 = vld [vmem:[%s299_s8] sm:$0xff]  ;;  %v346_v7 = vperm.slane %v344_v4, 0  ;;  %s286_s8 = sand.u32 1, %s858_s25   ;;  %s818_s21 = sshra.s32 %s637_s19, 4  ;;  %s819_s21 = int_to_ptr.hbm [resolvable:$true] %s818_s21 }
  0x19   : > { %v345_v5 = vperm.slane %v343_v3, 0  ;;  %s622_s20 = scalar_lea.sflag [#allocation3], %s286_s8  ;;  %p825_p0 = scmp.lt.s32.totalorder %s819_s21, %s1087_s7 }
  0x1a   : > { %v982_v9 = vsub.f32 %v344_v4, %v346_v7 }
  0x1b   : > { %729 = vmatmul.msk.bf16.vlgmr.msra.gmra.mxu0 %vm325_vm0, %v736_v2  ;;  %v977_v6 = vsub.f32 %v343_v3, %v345_v5 }
  0x1c   : > { %v350_v10 = vmul.f32 %v982_v9, %v982_v9 }
  0x1d   : > { %v349_v8 = vmul.f32 %v977_v6, %v977_v6 }
  0x1f   : > { %353 = vrot.lane.b32.xlu0 %v349_v8, %s868_s9  ;;  %361 = vrot.lane.b32.xlu1 %v349_v8, %s869_s13 }
  0x27   : > { %355 = vrot.lane.b32.xlu0 %v350_v10, %s868_s9  ;;  %363 = vrot.lane.b32.xlu1 %v350_v10, %s869_s13 }
  0x91   : > { %v354_v12 = vpop.permute.xlu0 %353  ;;  %v362_v13 = vpop.permute.xlu1 %361 }
  0x92   : > { %v359_v14 = vadd.f32 %v354_v12, %v349_v8  ;;  %v788_v8 = vld [vmem:[%s1083_s3] ss:$0 sm:$0xff] }
  0x93   : > { %v789_v12 = vld [vmem:[%s1084_s4] ss:$0 sm:$0xff] }
  0x94   : > { %v367_v15 = vadd.f32 %v362_v13, %v359_v14 }
  0x96   : > { %792 = vrsqrt.f32 %v367_v15  ;;  %vm376_vm1 = vcmp.eq.f32.partialorder %v367_v15, inf  ;;  %v379_v34 = vand.u32 2147483648, %v367_v15  ;;  %vm378_vm2 = vcmp.eq.f32.partialorder %v367_v15, 0.0 }
  0x98   : > { %v987_v16 = vpop.f32.mrf.mxu0 }
  0x99   : > { %v399_v17 = vperm.slane %v987_v16, 0  ;;  %v356_v18 = vpop.permute.xlu0 %355  ;;  %v364_v19 = vpop.permute.xlu1 %363 }
  0x9a   : > { %v360_v20 = vadd.f32 %v356_v18, %v350_v10 }
  0x9b   : > { %403 = vrot.lane.b32.xlu2 %v399_v17, %s871_s14  ;;  %v790_v17 = vld [vmem:[%s1085_s5] ss:$0 sm:$0xff] }
  0x9c   : > { %v793_v21 = vpop.eup %792  ;;  %v368_v22 = vadd.f32 %v364_v19, %v360_v20 }
  0x9d   : > { %v370_v23 = vmul.f32 %v793_v21, %v367_v15 }
  0x9e   : > { %794 = vrsqrt.f32 %v368_v22  ;;  %vm388_vm3 = vcmp.eq.f32.partialorder %v368_v22, inf  ;;  %v391_v44 = vand.u32 2147483648, %v368_v22  ;;  %vm390_vm4 = vcmp.eq.f32.partialorder %v368_v22, 0.0 }
  0x9f   : > { %v371_v25 = vmul.f32 %v793_v21, %v370_v23 }
  0xa0   : > { %v990_v24 = vpop.f32.mrf.mxu0 }
  0xa1   : > { %v400_v26 = vperm.slane %v990_v24, 0  ;;  %v372_v27 = vmul.f32 0.5, %v371_v25 }
  0xa3   : > { %405 = vrot.lane.b32.xlu2 %v400_v26, %s871_s14  ;;  %v373_v28 = vsub.f32 1.5, %v372_v27 }
  0xa4   : > { %v795_v29 = vpop.eup %794 }
  0xa5   : > { %v374_v30 = vmul.f32 %v793_v21, %v373_v28  ;;  %v382_v31 = vmul.f32 %v795_v29, %v368_v22 }
  0xa7   : > { %v375_v32 = vmul.f32 %v374_v30, %v367_v15  ;;  %v383_v33 = vmul.f32 %v795_v29, %v382_v31 }
  0xa9   : > { %v377_v35 = vsel %vm376_vm1, %v367_v15, %v375_v32  ;;  %v384_v36 = vmul.f32 0.5, %v383_v33 }
  0xaa   : > { %v993_v37 = vsel %vm378_vm2, %v379_v34, %v377_v35 }
  0xab   : > { %414 = vperm.xlu0 %785, %v993_v37   ;;  %v471_v38 = vmul.f32 0.22222222, %v993_v37  ;;  %v385_v39 = vsub.f32 1.5, %v384_v36  ;;  %vm393_vm7 = vcmp.le.f32.partialorder %v993_v37, 4.5  ;;  %v491_v34 = vadd.f32 1e-08, %v993_v37 }
  0xac   : > { %v730_v62 = vsel %vm393_vm7, 1.0, %v872_v51  ;;  %v791_v37 = vld [vmem:[%s1086_s6] ss:$0 sm:$0xff] }
  0xad   : > { %v386_v40 = vmul.f32 %v795_v29, %v385_v39  ;;  %v473_v41 = vmul.f32 %v471_v38, %v471_v38  ;;  %v479_v42 = vmul.f32 15.0, %v471_v38  ;;  %v546_v30 = vsel %vm545_vm6, %v730_v62, 0.0 }
  0xae   : > { %v547_v32 = vrot.slane %v546_v30, 4  ;;  %796 = vrcp.f32 %v491_v34 }
  0xaf   : > { %v387_v43 = vmul.f32 %v386_v40, %v368_v22  ;;  %v475_v45 = vmul.f32 %v473_v41, %v473_v41  ;;  %v481_v46 = vsub.f32 35.0, %v479_v42 }
  0xb1   : > { %v389_v47 = vsel %vm388_vm3, %v368_v22, %v387_v43  ;;  %v483_v49 = vmul.f32 %v481_v46, %v471_v38  ;;  %v477_v53 = vmul.f32 %v475_v45, %v471_v38 }
  0xb2   : > { %v997_v48 = vsel %vm390_vm4, %v391_v44, %v389_v47 }
  0xb3   : > { %419 = vperm.xlu1 %786, %v997_v48   ;;  %v472_v50 = vmul.f32 0.22222222, %v997_v48  ;;  %vm394_vm5 = vcmp.le.f32.partialorder %v997_v48, 4.5  ;;  %v485_v54 = vadd.f32 -21.0, %v483_v49  ;;  %v492_v43 = vadd.f32 1e-08, %v997_v48 }
  0xb4   : > { %v731_v52 = vsel %vm394_vm5, 1.0, %v872_v51  ;;  %v797_v40 = vpop.eup %796 }
  0xb5   : > { %v474_v55 = vmul.f32 %v472_v50, %v472_v50  ;;  %v480_v56 = vmul.f32 15.0, %v472_v50  ;;  %v1003_v57 = vsel %vm545_vm6, %v731_v52, 0.0  ;;  %v487_v58 = vmul.f32 %v485_v54, %v477_v53 }
  0xb7   : > { %v476_v59 = vmul.f32 %v474_v55, %v474_v55  ;;  %v482_v60 = vsub.f32 35.0, %v480_v56  ;;  %v489_v61 = vadd.f32 1.0, %v487_v58 }
  0xb9   : > { %v484_v63 = vmul.f32 %v482_v60, %v472_v50  ;;  %v1006_v0 = vmul.f32 %v730_v62, %v489_v61  ;;  %v478_v1 = vmul.f32 %v476_v59, %v472_v50 }
  0xbb   : > { %v486_v2 = vadd.f32 -21.0, %v484_v63 }
  0xbd   : > { %v488_v3 = vmul.f32 %v486_v2, %v478_v1 }
  0xbf   : > { %v490_v4 = vadd.f32 1.0, %v488_v3 }
  0xc1   : > { %v1008_v5 = vmul.f32 %v731_v52, %v490_v4  ;;  %v554_v52 = vrot.slane %v1003_v57, 4 }
  0xc3   : > { %v555_v53 = vadd.f32 %v554_v52, %v1003_v57 }
  0xc5   : > { %v556_v54 = vrot.slane %v555_v53, 2 }
  0xc7   : > { %v557_v55 = vadd.f32 %v556_v54, %v555_v53 }
  0xc9   : > { %v558_v56 = vrot.slane %v557_v55, 1 }
  0xcb   : > { %v559_v58 = vadd.f32 %v558_v56, %v557_v55 }
  0xf5   : > { %v404_v7 = vpop.permute.xlu2 %403 }
  0xf6   : > { %v409_v11 = vadd.f32 %v404_v7, %v987_v16 }
  0xfd   : > { %v406_v18 = vpop.permute.xlu2 %405 }
  0xfe   : > { %v410_v21 = vadd.f32 %v406_v18, %v990_v24  ;;  %v548_v24 = vadd.f32 %v547_v32, %v546_v30 }
 0x100   : > { %v549_v33 = vrot.slane %v548_v24, 2 }
 0x102   : > { %v550_v35 = vadd.f32 %v549_v33, %v548_v24 }
 0x104   : > { %v551_v36 = vrot.slane %v550_v35, 1 }
 0x106   : > { %v552_v38 = vadd.f32 %v551_v36, %v550_v35 }
 0x108   : > { %798 = vrcp.f32 %v552_v38 }
 0x109   : > { %800 = vrcp.f32 %v492_v43 }
 0x10a   : > { %802 = vrcp.f32 %v559_v58 }
 0x10e   : > { %v799_v42 = vpop.eup %798 }
 0x10f   : > { %v801_v44 = vpop.eup %800 }
 0x110   : > { %v803_v61 = vpop.eup %802 }
 0x11d   : > { %v415_v10 = vpop.permute.xlu0 %414 }
 0x11e   : > { %v425_v13 = vmul.f32 %v788_v8, %v415_v10 }
 0x120   : > { %v427_v14 = vadd.f32 %v425_v13, %v409_v11 }
 0x122   : > { %v433_v15 = vadd.f32 %v789_v12, %v427_v14 }
 0x124   : > { %v435_v19 = vmax.f32 %v433_v15, 0.0 }
 0x125   : > { %v420_v20 = vpop.permute.xlu1 %419 }
 0x126   : > { %v426_v22 = vmul.f32 %v788_v8, %v420_v20  ;;  %v441_v23 = vmul.f32 %v790_v17, %v435_v19 }
 0x128   : > { %v428_v25 = vadd.f32 %v426_v22, %v410_v21  ;;  %457 = vrot.lane.b32.xlu2 %v441_v23, %s873_s22  ;;  %v444_v50 = vsel %vm325_vm0, %v441_v23, 0.0 }
 0x12a   : > { %v434_v16 = vadd.f32 %v789_v12, %v428_v25 }
 0x12c   : > { %v436_v26 = vmax.f32 %v434_v16, 0.0 }
 0x12e   : > { %v442_v27 = vmul.f32 %v790_v17, %v436_v26 }
 0x130   : > { %459 = vrot.lane.b32.xlu1 %v442_v27, %s873_s22  ;;  %v447_v31 = vsel %vm325_vm0, %v442_v27, 0.0  ;;  %s820_s22 = scalar_lea.hbm %s819_s21, 2 }
 0x131   : > { %p821_p11 = scmp.ne.s32.totalorder %s819_s21, %s820_s22  ;;  %p826_p1 = scmp.lt.s32.totalorder %s824_s29, %s820_s22 }
 0x133   : > { %p822_p12 = pnand %p821_p11, %p950_p5  ;;  %p827_p2 = por %p826_p1, %p825_p0 }
 0x135   : > { %p823_p13 = pneg %p822_p12 }
 0x137   : > { %p828_p3 = pnand %p827_p2, %p823_p13 }
 0x182   : > { %v458_v28 = vpop.permute.xlu2 %457 }
 0x183   : > { %v463_v29 = vsel %vm325_vm0, %v458_v28, 0.0 }
 0x184   : > { %464 = vadd.xlane.f32.xlu2 %v463_v29 }
 0x18c   : > { %448 = vadd.xlane.f32.xlu2 %v447_v31 }
 0x1a2   : > { %v460_v39 = vpop.permute.xlu1 %459 }
 0x1a3   : > { %v466_v41 = vsel %vm325_vm0, %v460_v39, 0.0 }
 0x1a4   : > { %467 = vadd.xlane.f32.xlu0 %v466_v41  ;;  %497 = vperm.xlu2 %787, %v797_v40  }
 0x1ac   : > { %579 = vperm.xlu2 %787, %v799_v42  }
 0x1b8   : > { %502 = vperm.xlu0 %785, %v801_v44  }
 0x1f7   : > { %v465_v45 = vpop.xlane.xlu2 %464 }
 0x1f8   : > { %v469_v46 = vadd.f32 %v791_v37, %v465_v45 }
 0x1fa   : > { %525 = vrot.lane.b32.xlu1 %v469_v46, %s868_s9 }
 0x1ff   : > { %v449_v62 = vpop.xlane.xlu2 %448 }
 0x200   : > { %v454_v63 = vadd.f32 %v791_v37, %v449_v62 }
 0x202   : > { %v510_v1 = vmul.f32 %v1008_v5, %v454_v63 }
 0x207   : > { %v498_v4 = vpop.permute.xlu2 %497 }
 0x208   : > { %v505_v8 = vmul.f32 %v498_v4, %v977_v6 }
 0x20f   : > { %v580_v27 = vpop.permute.xlu2 %579 }
 0x217   : > { %v468_v47 = vpop.xlane.xlu0 %467 }
 0x218   : > { %v470_v49 = vadd.f32 %v791_v37, %v468_v47 }
 0x21a   : > { %527 = vrot.lane.b32.xlu1 %v470_v49, %s868_s9  ;;  %s712_s9 = sshll.u32 %s286_s8, 1 }
 0x21b   : > { %s288_s17 = scalar_lea.vmem [#allocation2], %s712_s9 }
 0x21c   : > { %s634_s18 = sshll.u32 %s288_s17, 4  ;;  %s635_s18 = int_to_ptr.vmem [resolvable:$true] %s634_s18 }
 0x22a   : > { %v503_v12 = vpop.permute.xlu0 %502 }
 0x22b   : > { %v506_v15 = vmul.f32 %v503_v12, %v982_v9 }
 0x244   : > { %445 = vadd.xlane.f32.xlu1 %v444_v50 }
 0x26c   : > { %v526_v51 = vpop.permute.xlu1 %525 }
 0x26d   : > { %v531_v48 = vmul.f32 %v526_v51, %v1006_v0 }
 0x26f   : > { %535 = vperm.xlu1 %786, %v531_v48  }
 0x28c   : > { %v528_v59 = vpop.permute.xlu1 %527 }
 0x28d   : > { %v532_v60 = vmul.f32 %v528_v59, %v1008_v5 }
 0x28f   : > { %540 = vperm.xlu0 %785, %v532_v60  }
 0x297   : > { %584 = vperm.xlu0 %785, %v803_v61  }
 0x29f   : > { %518 = vperm.xlu0 %785, %v510_v1  }
 0x2b7   : > { %v446_v2 = vpop.xlane.xlu1 %445 }
 0x2b8   : > { %v453_v3 = vadd.f32 %v791_v37, %v446_v2 }
 0x2ba   : > { %v509_v57 = vmul.f32 %v1006_v0, %v453_v3 }
 0x2bc   : > { %513 = vperm.xlu2 %787, %v509_v57  }
 0x2e1   : > { %v536_v7 = vpop.permute.xlu1 %535 }
 0x2e2   : > { %v543_v10 = vmul.f32 %v536_v7, %v505_v8 }
 0x2e4   : > { %v589_v11 = vsel %vm562_vm8, %v543_v10, 0.0 }
 0x2e5   : > { %v590_v13 = vrot.slane %v589_v11, 4 }
 0x2e7   : > { %v591_v14 = vadd.f32 %v590_v13, %v589_v11 }
 0x2e9   : > { %v592_v5 = vrot.slane %v591_v14, 2 }
 0x2eb   : > { %v593_v0 = vadd.f32 %v592_v5, %v591_v14 }
 0x2ed   : > { %v594_v22 = vrot.slane %v593_v0, 1 }
 0x2ef   : > { %v595_v16 = vadd.f32 %v594_v22, %v593_v0 }
 0x2f1   : > { %v603_v9 = vmul.f32 %v595_v16, %v580_v27 }
 0x301   : > { %v541_v17 = vpop.permute.xlu0 %540 }
 0x302   : > { %v544_v18 = vmul.f32 %v541_v17, %v506_v15 }
 0x304   : > { %v596_v19 = vsel %vm562_vm8, %v544_v18, 0.0 }
 0x305   : > { %v597_v20 = vrot.slane %v596_v19, 4 }
 0x307   : > { %v598_v21 = vadd.f32 %v597_v20, %v596_v19 }
 0x309   : > { %v599_v23 = vrot.slane %v598_v21, 2  ;;  %v585_v6 = vpop.permute.xlu0 %584 }
 0x30b   : > { %v600_v25 = vadd.f32 %v599_v23, %v598_v21 }
 0x30d   : > { %v601_v26 = vrot.slane %v600_v25, 1 }
 0x30f   : > { %v602_v28 = vadd.f32 %v601_v26, %v600_v25 }
 0x311   : > { %v604_v29 = vmul.f32 %v602_v28, %v585_v6  ;;  %v519_v30 = vpop.permute.xlu0 %518 }
 0x312   : > { %v522_v31 = vmul.f32 %v519_v30, %v506_v15 }
 0x313   : > { %v612_v32 = vsel %vm607_vm9, %v604_v29, %v603_v9 }
 0x314   : > { %v570_v24 = vsel %vm562_vm8, %v522_v31, 0.0  ;;  %613 = vrot.lane.b32.xlu2 %v612_v32, %s874_s28 }
 0x315   : > { %v571_v33 = vrot.slane %v570_v24, 4 }
 0x316   : > { %v514_v34 = vpop.permute.xlu2 %513 }
 0x317   : > { %v572_v35 = vadd.f32 %v571_v33, %v570_v24  ;;  %v521_v36 = vmul.f32 %v514_v34, %v505_v8 }
 0x319   : > { %v573_v38 = vrot.slane %v572_v35, 2  ;;  %v563_v39 = vsel %vm562_vm8, %v521_v36, 0.0 }
 0x31a   : > { %v564_v40 = vrot.slane %v563_v39, 4 }
 0x31b   : > { %v574_v41 = vadd.f32 %v573_v38, %v572_v35 }
 0x31c   : > { %v565_v42 = vadd.f32 %v564_v40, %v563_v39 }
 0x31d   : > { %v575_v43 = vrot.slane %v574_v41, 1 }
 0x31e   : > { %v566_v44 = vrot.slane %v565_v42, 2 }
 0x31f   : > { %v576_v37 = vadd.f32 %v575_v43, %v574_v41 }
 0x320   : > { %v567_v45 = vadd.f32 %v566_v44, %v565_v42 }
 0x321   : > { %v588_v46 = vmul.f32 %v585_v6, %v576_v37 }
 0x322   : > { %v568_v47 = vrot.slane %v567_v45, 1 }
 0x324   : > { %v569_v49 = vadd.f32 %v568_v47, %v567_v45 }
 0x326   : > { %v587_v50 = vmul.f32 %v580_v27, %v569_v49 }
 0x328   : > { %v608_v51 = vsel %vm607_vm9, %v588_v46, %v587_v50 }
 0x36e   : > { %v614_v48 = vpop.permute.xlu2 %613 }
 0x36f   : > { %v616_v52 = vsel %vm562_vm8, %v608_v51, %v614_v48 }
 0x370   : > { %v618_v53 = vsel %vm617_vm10, %v616_v52, 0.0 }
 0x371   : > { %620 = vst.msk [vmem:[%s288_s17] sm:$0x3] %vm619_vm11, %v618_v53 }
 0x372   : > { %831 = shalt.err (!%p828_p3)
}
 0x373   : > { %739 = dma.vmem_to_hbm [thread:$0]  (%p950_p5), %s635_s18, 32, %s637_s19, %s622_s20  }
 0x374 PF: > { %p745_p4 = scmp.ge.s32.totalorder %s866_s27, 2  ;;  %s648_s8 = sand.u32 1, %s854_s24  }
 0x375   : > { %s649_s13 = scalar_lea.sflag [#allocation3], %s648_s8 }
 0x376   : > { %p742_p7 = pnand %p745_p4, %p954_p6 }
 0x378   : > { %p743_p8 = pneg %p742_p7 }
 0x37a   : > { %849 = dma.done.wait (%p743_p8), %s649_s13, 32  }
 0x37b   : > { %851 = vsyncadd (%p743_p8), %s649_s13, 4294967264  ;;  %p17_p9 = scmp.ge.s32.totalorder %s938_s30, 4   ;;  %s1090_s24 = smov %s858_s25 }
 0x37c   : > { %s1091_s25 = smov %s862_s26  ;;  %s1092_s26 = smov %s948_s10 }
 0x37d   : > { %s1093_s27 = smov %s938_s30  ;;  %19 = sbr.rel (!%p17_p9) target bundleno = 3 (0x3), region = 86 }
 0x382   :  { %655 = vsyncpa [#allocation3], 1 }
 0x383   :  { %657 = vsyncpa [#allocation3 + $0x1], 1 }

</bundles_post_ra>
